<compile_context>
chip_gen: v7x
topology: tpu7x:2x2x1
jax: 0.10.0
libtpu: 0.0.40
codegen_flags: <defaults>
</compile_context>

<pallas_src>
import math

import jax
import jax.numpy as jnp
import numpy as np
from jax.experimental import pallas as pl
from jax.experimental.pallas import tpu as pltpu

V_JOINTS = 25
BN_EPS = 1e-5
_VMEM_LIMIT = 48 * 1024 * 1024  # > default scoped limit on all gens, < v7x physical


# ----------------------------- Pallas kernels ------------------------------ #

def _gcn_linear_kernel(x_ref, m_ref, w_ref, o_ref):
    """Shift_gcn core on a flat 2-D row tile: (x_shifted * mask) @ W.

    x_ref: (BR, C)   shift_in-permuted rows (BR = tm*25 "NT*joint" rows)
    m_ref: (BR, C)   tanh(Feature_Mask)+1, tiled to the block (period 25 rows)
    w_ref: (C, Co)   Linear_weight
    o_ref: (BR, Co)
    """
    o_ref[...] = jnp.dot(x_ref[...] * m_ref[...], w_ref[...],
                         preferred_element_type=jnp.float32)


def _tail_kernel(zp_ref, res_ref, s1_ref, b1_ref, wt_ref, bt_ref,
                 sb_ref, bb_ref, o_ref):
    """Fused tail: gcn BN1d + residual + ReLU -> Shift_tcn -> unit residual + ReLU.

    zp_ref: (BR, Co)  shift_out-permuted GCN matmul output
    res_ref:(BR, C)   original input rows (identity residual path, C == Co)
    s1/b1:  (BR, Co)  BatchNorm1d(25*Co) eval scale / (bias + folded Linear_bias)
    wt:     (Co, Co)  temporal_linear weight with Shift_tcn.bn scale folded in
    bt:     (1, Co)   temporal_linear bias with Shift_tcn.bn bias folded in
    sb/bb:  (1, Co)   Shift_tcn.bn2 (BatchNorm2d) eval scale / bias
    o_ref:  (BR, Co)
    """
    res = res_ref[...]
    # Shift_gcn tail: BN1d + inner residual + ReLU.
    g = jnp.maximum(zp_ref[...] * s1_ref[...] + b1_ref[...] + res, 0.0)
    # Shift_tcn: (bn folded into wt/bt) -> identity temporal shift -> 1x1 conv -> ReLU.
    u = jnp.dot(g, wt_ref[...], preferred_element_type=jnp.float32)
    u = jnp.maximum(u + bt_ref[...], 0.0)
    # bn2, unit residual, final ReLU.
    o_ref[...] = jnp.maximum(u * sb_ref[...] + bb_ref[...] + res, 0.0)


# ------------------------------- Parameters -------------------------------- #

def _shift_indices(c_in, c_out):
    """Exact index tables from Shift_gcn.__init__ (shift_in / shift_out)."""
    idx_in = np.empty(V_JOINTS * c_in, dtype=np.int32)
    for i in range(V_JOINTS):
        for j in range(c_in):
            idx_in[i * c_in + j] = (i * c_in + j + j * c_in) % (c_in * V_JOINTS)
    idx_out = np.empty(V_JOINTS * c_out, dtype=np.int32)
    for i in range(V_JOINTS):
        for j in range(c_out):
            idx_out[i * c_out + j] = (i * c_out + j - j * c_out) % (c_out * V_JOINTS)
    return jnp.asarray(idx_in), jnp.asarray(idx_out)


def init_params(key, c_in, c_out=None):
    c_out = c_in if c_out is None else c_out
    k1, k2, k3 = jax.random.split(key, 3)

    # Shift_gcn parameters.
    linear_w = jax.random.normal(k1, (c_in, c_out), jnp.float32) * math.sqrt(1.0 / c_out)
    linear_b = jnp.zeros((1, c_out), jnp.float32)
    feature_mask = jnp.zeros((V_JOINTS, c_in), jnp.float32)          # constant 0 init

    # BatchNorm1d(25*c_out): gamma=1, beta=0, running stats (0, 1) -> eval affine.
    bn_scale = 1.0 / math.sqrt(1.0 + BN_EPS)
    bn1_scale = jnp.full((V_JOINTS, c_out), bn_scale, jnp.float32)
    bn1_bias = jnp.zeros((V_JOINTS, c_out), jnp.float32)

    # Shift_tcn BatchNorm2d(c_out) x2 (bn, bn2), eval-mode.
    bn_a_scale = jnp.full((1, c_out), bn_scale, jnp.float32)
    bn_a_bias = jnp.zeros((1, c_out), jnp.float32)
    bn_b_scale = jnp.full((1, c_out), bn_scale, jnp.float32)
    bn_b_bias = jnp.zeros((1, c_out), jnp.float32)

    # temporal_linear = Conv2d(c_out, c_out, 1): kaiming_normal(fan_out) weight,
    # default PyTorch uniform bias.
    conv_w = jax.random.normal(k2, (c_out, c_out), jnp.float32) * math.sqrt(2.0 / c_out)
    bound = 1.0 / math.sqrt(c_out)
    conv_b = jax.random.uniform(k3, (1, c_out), jnp.float32, -bound, bound)
    wt = conv_w.T                                                     # (Cin, Cout)

    idx_in, idx_out = _shift_indices(c_in, c_out)

    return dict(linear_w=linear_w, linear_b=linear_b, feature_mask=feature_mask,
                bn1_scale=bn1_scale, bn1_bias=bn1_bias,
                bn_a_scale=bn_a_scale, bn_a_bias=bn_a_bias,
                bn_b_scale=bn_b_scale, bn_b_bias=bn_b_bias,
                wt=wt, conv_b=conv_b, idx_in=idx_in, idx_out=idx_out)


def _fold_params(params):
    """Pre-fold BN affines / biases (tiny one-time wrapper-side math)."""
    mask = jnp.tanh(params["feature_mask"]) + 1.0                    # (V, C)
    s1 = params["bn1_scale"]                                         # (V, Co)
    # Linear_bias is per-channel -> commutes with shift_out -> fold into BN1d bias.
    b1 = params["bn1_bias"] + params["linear_b"] * s1                # (V, Co)
    # Shift_tcn.bn (pre-conv, per channel): fold scale into conv rows, bias into conv bias.
    wt_f = params["bn_a_scale"].reshape(-1, 1) * params["wt"]        # (Co, Co)
    bt_f = params["bn_a_bias"] @ params["wt"] + params["conv_b"]     # (1, Co)
    return mask, s1, b1, wt_f, bt_f, params["bn_b_scale"], params["bn_b_bias"]


def _pick_tm(nt, c_max):
    """Pick NT rows per grid step: divides NT, multiple of 8 (8-aligned block
    rows), capped at 512 rows and ~2 MiB f32 per activation block."""
    target = max(8, min(512, (2 << 20) // (V_JOINTS * c_max * 4)))
    tm = None
    d = 8
    while d <= min(nt, target):
        if nt % d == 0:
            tm = d
        d += 8
    if tm is None:
        tm = nt          # single block == full array -> always a legal block shape
    return tm


# -------------------------------- Forward ---------------------------------- #

def tcn_gcn_unit_forward(x0, params, tm=None):
    """x0: (N, C, T, V) float32 -> (N, C_out, T, V) float32."""
    n, c, t, v = x0.shape
    assert v == V_JOINTS, "Shift-GCN hard-codes 25 joints"
    c_out = params["linear_w"].shape[1]
    assert c == c_out, "identity residual path requires in_channels == out_channels"
    nt = n * t
    if tm is None:
        tm = _pick_tm(nt, max(c, c_out))
    assert nt % tm == 0 and (tm % 8 == 0 or tm == nt)
    rows = nt * v
    br = tm * v                      # rows per block
    grid = (nt // tm,)

    mask, s1, b1, wt_f, bt_f, sb, bb = _fold_params(params)
    # Tile per-(joint, channel) params to one row block so both kernels run on
    # flat 2-D tiles.  Constant index_map -> DMA'd once, stays resident in VMEM.
    mask_t = jnp.tile(mask, (tm, 1))   # (br, C)
    s1_t = jnp.tile(s1, (tm, 1))       # (br, Co)
    b1_t = jnp.tile(b1, (tm, 1))       # (br, Co)

    # Layout glue (XLA): NCHW -> channels-last flat rows + shift_in permutation.
    x = jnp.transpose(x0, (0, 2, 3, 1)).reshape(nt, v * c)
    x_shift = jnp.take(x, params["idx_in"], axis=1).reshape(rows, c)
    res = x.reshape(rows, c)           # identity residual path

    cparams = pltpu.CompilerParams(dimension_semantics=("parallel",),
                                   vmem_limit_bytes=_VMEM_LIMIT)

    z = pl.pallas_call(
        _gcn_linear_kernel,
        out_shape=jax.ShapeDtypeStruct((rows, c_out), jnp.float32),
        grid=grid,
        in_specs=[pl.BlockSpec((br, c), lambda i: (i, 0)),
                  pl.BlockSpec((br, c), lambda i: (0, 0)),
                  pl.BlockSpec((c, c_out), lambda i: (0, 0))],
        out_specs=pl.BlockSpec((br, c_out), lambda i: (i, 0)),
        compiler_params=cparams,
    )(x_shift, mask_t, params["linear_w"])

    # shift_out permutation between the two channel-mixing matmuls (XLA gather).
    zp = jnp.take(z.reshape(nt, v * c_out), params["idx_out"], axis=1).reshape(rows, c_out)

    out = pl.pallas_call(
        _tail_kernel,
        out_shape=jax.ShapeDtypeStruct((rows, c_out), jnp.float32),
        grid=grid,
        in_specs=[pl.BlockSpec((br, c_out), lambda i: (i, 0)),
                  pl.BlockSpec((br, c), lambda i: (i, 0)),
                  pl.BlockSpec((br, c_out), lambda i: (0, 0)),
                  pl.BlockSpec((br, c_out), lambda i: (0, 0)),
                  pl.BlockSpec((c_out, c_out), lambda i: (0, 0)),
                  pl.BlockSpec((1, c_out), lambda i: (0, 0)),
                  pl.BlockSpec((1, c_out), lambda i: (0, 0)),
                  pl.BlockSpec((1, c_out), lambda i: (0, 0))],
        out_specs=pl.BlockSpec((br, c_out), lambda i: (i, 0)),
        compiler_params=cparams,
    )(zp, res, s1_t, b1_t, wt_f, bt_f, sb, bb)

    # back to NCHW: (NT*V, Co) -> (N, Co, T, V)
    return jnp.transpose(out.reshape(n, t, v, c_out), (0, 3, 1, 2))


# ------------------------- Pure-JAX reference ------------------------------ #

def _reference_forward(x0, params):
    """Direct (unfolded) translation of the PyTorch forward, in plain JAX."""
    n, c, t, v = x0.shape
    co = params["linear_w"].shape[1]
    nt = n * t
    x = jnp.transpose(x0, (0, 2, 3, 1)).reshape(nt, v * c)
    xs = jnp.take(x, params["idx_in"], axis=1).reshape(nt, v, c)
    xs = xs * (jnp.tanh(params["feature_mask"]) + 1.0)[None]
    z = jnp.einsum("nwc,cd->nwd", xs, params["linear_w"]) + params["linear_b"][None]
    zp = jnp.take(z.reshape(nt, v * co), params["idx_out"], axis=1).reshape(nt, v, co)
    zp = zp * params["bn1_scale"][None] + params["bn1_bias"][None]
    res = x.reshape(nt, v, c)
    g = jnp.maximum(zp + res, 0.0)
    h = g * params["bn_a_scale"][None] + params["bn_a_bias"][None]
    u = jnp.maximum(h @ params["wt"] + params["conv_b"][None], 0.0)
    w = u * params["bn_b_scale"][None] + params["bn_b_bias"][None]
    out = jnp.maximum(w + res, 0.0)
    return jnp.transpose(out.reshape(n, t, v, co), (0, 3, 1, 2))


if __name__ == "__main__":
    key = jax.random.PRNGKey(0)
    kx, kp = jax.random.split(key)

    N, C, T, V = 2, 16, 64, 25  # V fixed at 25 by the module
    x = jax.random.normal(kx, (N, C, T, V), jnp.float32)
    params = init_params(kp, C)

    # tm=32 -> 4-step grid so the multi-block pipeline / index maps are exercised.
    out = tcn_gcn_unit_forward(x, params, tm=32)
    out = jax.block_until_ready(out)

    assert out.shape == (N, C, T, V)
    assert bool(jnp.all(out >= 0.0))          # final ReLU
    assert bool(jnp.all(jnp.isfinite(out)))

    ref = _reference_forward(x, params)
    max_err = float(jnp.max(jnp.abs(out - ref)))
    assert bool(jnp.allclose(out, ref, atol=1e-1, rtol=1e-1)), max_err

    print("KERNEL_OK")
</pallas_src>

<mosaic_0001>
module attributes {stable_mosaic.version = 11 : i64} {
  func.func @_gcn_linear_kernel(%arg0: i32, %arg1: memref<800x16xf32, #tpu.memory_space<vmem>>, %arg2: memref<800x16xf32, #tpu.memory_space<vmem>>, %arg3: memref<16x16xf32, #tpu.memory_space<vmem>>, %arg4: memref<800x16xf32, #tpu.memory_space<vmem>>) attributes {dimension_semantics = [#tpu.dimension_semantics<parallel>], iteration_bounds = array<i64: 4>, scalar_prefetch = 0 : i64, scratch_operands = 0 : i64, tpu.core_type = #tpu.core_type<tc>, window_params = [{transform_indices = @transform_0, window_bounds = array<i64: 800, 16>}, {pipeline_mode = #tpu.pipeline_mode<synchronous>, transform_indices = @transform_1, window_bounds = array<i64: 800, 16>}, {pipeline_mode = #tpu.pipeline_mode<synchronous>, transform_indices = @transform_2, window_bounds = array<i64: 16, 16>}, {transform_indices = @transform_3, window_bounds = array<i64: 800, 16>}]} {
    %c0 = arith.constant 0 : index
    %c0_0 = arith.constant 0 : index
    %0 = vector.load %arg1[%c0, %c0_0] : memref<800x16xf32, #tpu.memory_space<vmem>>, vector<800x16xf32>
    %c0_1 = arith.constant 0 : index
    %c0_2 = arith.constant 0 : index
    %1 = vector.load %arg2[%c0_1, %c0_2] : memref<800x16xf32, #tpu.memory_space<vmem>>, vector<800x16xf32>
    %2 = arith.mulf %0, %1 : vector<800x16xf32>
    %c0_3 = arith.constant 0 : index
    %c0_4 = arith.constant 0 : index
    %3 = vector.load %arg3[%c0_3, %c0_4] : memref<16x16xf32, #tpu.memory_space<vmem>>, vector<16x16xf32>
    %cst = arith.constant dense<0.000000e+00> : vector<800x16xf32>
    %4 = tpu.matmul %2, %3, %cst {dimension_numbers = #tpu.dot_dimension_numbers<[1], [0], [0], [1], [0, 0, 1, 1], [], []>} : vector<800x16xf32>, vector<16x16xf32>, vector<800x16xf32> -> vector<800x16xf32>
    %c0_5 = arith.constant 0 : index
    %c0_6 = arith.constant 0 : index
    %5 = vector.load %arg4[%c0_5, %c0_6] : memref<800x16xf32, #tpu.memory_space<vmem>>, vector<800x16xf32>
    tpu.vector_store %arg4[%c0_5, %c0_6], %4 {strides = array<i32>} : memref<800x16xf32, #tpu.memory_space<vmem>>, vector<800x16xf32>,
    return
  }
  func.func @transform_0(%arg0: i32) -> (i32, i32) {
    %c0_i32 = arith.constant 0 : i32
    %c0_i32_0 = arith.constant 0 : i32
    return %arg0, %c0_i32 : i32, i32
  }
  func.func @transform_1(%arg0: i32) -> (i32, i32) {
    %c0_i32 = arith.constant 0 : i32
    %c0_i32_0 = arith.constant 0 : i32
    %c0_i32_1 = arith.constant 0 : i32
    return %c0_i32, %c0_i32_0 : i32, i32
  }
  func.func @transform_2(%arg0: i32) -> (i32, i32) {
    %c0_i32 = arith.constant 0 : i32
    %c0_i32_0 = arith.constant 0 : i32
    %c0_i32_1 = arith.constant 0 : i32
    return %c0_i32, %c0_i32_0 : i32, i32
  }
  func.func @transform_3(%arg0: i32) -> (i32, i32) {
    %c0_i32 = arith.constant 0 : i32
    %c0_i32_0 = arith.constant 0 : i32
    return %arg0, %c0_i32 : i32, i32
  }
}

</mosaic_0001>

<bundles_post_ra>
// kernel: tpu_custom_call.1
= control target key start
LH: loop header
LB: loop body
LE: loop exit
PB: predicated region body
PF: predicated region fallthrough
CT: control target
= control target key end

     0   :  { %s1905_s12 = smov 0   ;;  %s2639_s0 = inlined_call_operand.vmem [shape: f32[3200,16], index: 0, kind: input, shape index: {}]   ;;  %s2640_s1 = inlined_call_operand.vmem [shape: f32[800,16], index: 1, kind: input, shape index: {}]   ;;  %s2641_s2 = inlined_call_operand.vmem [shape: f32[16,16], index: 2, kind: input, shape index: {}]   ;;  %s2642_s3 = inlined_call_operand.vmem [shape: f32[3200,16], index: 3, kind: output, shape index: {}]  }
   0x1 LB: > { %s1498_s13 = sadd.s32 4294967295, %s1883_s12   ;;  %p1502_p0 = scmp.ge.s32.totalorder %s1883_s12, 1  ;;  %s1883_s12 = sphi %s1905_s12, %s13_s12  }
   0x2   : > { %p138_p1 = scmp.lt.s32.totalorder %s1883_s12, 5 }
   0x4   : > { %p139_p2 = pnand %p1502_p0, %p138_p1 }
   0x5   : > { %v474_v0 = vld [vmem:[%s2641_s2] sm:$0xff] (!%p139_p2)  ;;  %v475_v1 = vld [vmem:[%s2641_s2 + $0x8] sm:$0xff] (!%p139_p2)  ;;  %s162_s18 = smul.u32 (!%p139_p2), 100, %s1498_s13  ;;  %v324_v4 = vld [vmem:[%s2640_s1 + $0x190] sm:$0xff] (!%p139_p2)  ;;  %vm476_vm0 = vcmask (!%p139_p2), 130048  }
   0x6   : > { %142 = sbr.rel (%p139_p2) target bundleno = 330 (0x14a), region = 32  ;;  %v1863_v2 = vpack.c.bf16 (!%p139_p2), %v475_v1, %v474_v0  ;;  %v274_v3 = vld [vmem:[%s2640_s1] sm:$0xff] (!%p139_p2)  ;;  %v275_v5 = vld [vmem:[%s2640_s1 + $0x8] sm:$0xff] (!%p139_p2)  ;;  %v325_v6 = vld [vmem:[%s2640_s1 + $0x198] sm:$0xff] (!%p139_p2) }
   0x7   : > { %p163_p3 = scmp.lt.s32.totalorder (!%p139_p2), %s162_s18, 399  ;;  %v276_v7 = vld [vmem:[%s2640_s1 + $0x10] sm:$0xff] (!%p139_p2)  ;;  %v326_v8 = vld [vmem:[%s2640_s1 + $0x1a0] sm:$0xff] (!%p139_p2)  ;;  %v277_v9 = vld [vmem:[%s2640_s1 + $0x18] sm:$0xff] (!%p139_p2) }
   0x8   : > { %1864 = vmatprep.subr.bf16.mxu0 (!%p139_p2), %v1863_v2  ;;  %1867 = vmatprep.subr.bf16.mxu1 (!%p139_p2), %v1863_v2  ;;  %v327_v10 = vld [vmem:[%s2640_s1 + $0x1a8] sm:$0xff] (!%p139_p2)  ;;  %v278_v14 = vld [vmem:[%s2640_s1 + $0x20] sm:$0xff] (!%p139_p2)  ;;  %v328_v15 = vld [vmem:[%s2640_s1 + $0x1b0] sm:$0xff] (!%p139_p2) }
   0x9   : > { %1866 = vmatpush3.bf16.msra.mxu0 (!%p139_p2), %v1863_v2  ;;  %1868 = vmatpush3.bf16.msra.mxu1 (!%p139_p2), %v1863_v2  ;;  %v279_v31 = vld [vmem:[%s2640_s1 + $0x28] sm:$0xff] (!%p139_p2)  ;;  %v329_v32 = vld [vmem:[%s2640_s1 + $0x1b8] sm:$0xff] (!%p139_p2)  ;;  %v280_v37 = vld [vmem:[%s2640_s1 + $0x30] sm:$0xff] (!%p139_p2) }
   0xa   : > { %v330_v40 = vld [vmem:[%s2640_s1 + $0x1c0] sm:$0xff] (!%p139_p2)  ;;  %v281_v43 = vld [vmem:[%s2640_s1 + $0x38] sm:$0xff] (!%p139_p2)  ;;  %v331_v44 = vld [vmem:[%s2640_s1 + $0x1c8] sm:$0xff] (!%p139_p2) }
   0xb   : > { %v282_v49 = vld [vmem:[%s2640_s1 + $0x40] sm:$0xff] (!%p139_p2)  ;;  %v332_v52 = vld [vmem:[%s2640_s1 + $0x1d0] sm:$0xff] (!%p139_p2)  ;;  %v283_v55 = vld [vmem:[%s2640_s1 + $0x48] sm:$0xff] (!%p139_p2) }
   0xc   : > { %v333_v56 = vld [vmem:[%s2640_s1 + $0x1d8] sm:$0xff] (!%p139_p2)  ;;  %v284_v61 = vld [vmem:[%s2640_s1 + $0x50] sm:$0xff] (!%p139_p2)  ;;  %v334_v0 = vld [vmem:[%s2640_s1 + $0x1e0] sm:$0xff] (!%p139_p2) }
   0xd   : > { %s2644_s18 = smov (!%p163_p3, %s162_s18), 399 }
   0xe   : > { %s1503_s23 = sshll.u32 %s2644_s18, 3 }
   0xf   : > { %s1942_s5 = scalar_lea.vmem %s2639_s0, %s1503_s23  ;;  %s2434_s14 = scalar_lea.vmem %s2642_s3, %s1503_s23 }
  0x10   : > { %v174_v11 = vld [vmem:[%s1942_s5] sm:$0xff]  ;;  %v224_v12 = vld [vmem:[%s1942_s5 + $0x190] sm:$0xff]  ;;  %v175_v13 = vld [vmem:[%s1942_s5 + $0x8] sm:$0xff] }
  0x11   : > { %v374_v16 = vmul.f32 %v274_v3, %v174_v11  ;;  %v424_v17 = vmul.f32 %v324_v4, %v224_v12  ;;  %v375_v18 = vmul.f32 %v275_v5, %v175_v13  ;;  %v225_v19 = vld [vmem:[%s1942_s5 + $0x198] sm:$0xff]  ;;  %v176_v20 = vld [vmem:[%s1942_s5 + $0x10] sm:$0xff]  ;;  %v226_v21 = vld [vmem:[%s1942_s5 + $0x1a0] sm:$0xff] }
  0x12   : > { %v425_v22 = vmul.f32 %v325_v6, %v225_v19  ;;  %v376_v23 = vmul.f32 %v276_v7, %v176_v20  ;;  %v426_v24 = vmul.f32 %v326_v8, %v226_v21  ;;  %v177_v25 = vld [vmem:[%s1942_s5 + $0x18] sm:$0xff]  ;;  %v227_v26 = vld [vmem:[%s1942_s5 + $0x1a8] sm:$0xff]  ;;  %v178_v27 = vld [vmem:[%s1942_s5 + $0x20] sm:$0xff] }
  0x13   : > { %1713 = vmatprep.mubr.msk.f32.mxu0 %vm476_vm0, %v374_v16  ;;  %1788 = vmatprep.mubr.msk.f32.mxu1 %vm476_vm0, %v424_v17  ;;  %v228_v28 = vld [vmem:[%s1942_s5 + $0x1b0] sm:$0xff]  ;;  %v377_v29 = vmul.f32 %v277_v9, %v177_v25  ;;  %v427_v30 = vmul.f32 %v327_v10, %v227_v26  ;;  %v378_v33 = vmul.f32 %v278_v14, %v178_v27  ;;  %v179_v35 = vld [vmem:[%s1942_s5 + $0x28] sm:$0xff]  ;;  %v229_v36 = vld [vmem:[%s1942_s5 + $0x1b8] sm:$0xff] }
  0x14   : > { %1714 = vmatmul.mubr.msk.f32.vlgmr.msra.gmra.mrb[0].mxu0 %vm476_vm0, %v375_v18  ;;  %1789 = vmatmul.mubr.msk.f32.vlgmr.msra.gmra.mrb[0].mxu1 %vm476_vm0, %v425_v22  ;;  %v428_v34 = vmul.f32 %v328_v15, %v228_v28  ;;  %v180_v38 = vld [vmem:[%s1942_s5 + $0x30] sm:$0xff]  ;;  %v230_v39 = vld [vmem:[%s1942_s5 + $0x1c0] sm:$0xff]  ;;  %v379_v41 = vmul.f32 %v279_v31, %v179_v35  ;;  %v429_v42 = vmul.f32 %v329_v32, %v229_v36  ;;  %v181_v47 = vld [vmem:[%s1942_s5 + $0x38] sm:$0xff] }
  0x15   : > { %1716 = vmatprep.mubr.msk.f32.mxu0 %vm476_vm0, %v376_v23  ;;  %1791 = vmatprep.mubr.msk.f32.mxu1 %vm476_vm0, %v426_v24  ;;  %v380_v45 = vmul.f32 %v280_v37, %v180_v38  ;;  %v430_v46 = vmul.f32 %v330_v40, %v230_v39  ;;  %v231_v48 = vld [vmem:[%s1942_s5 + $0x1c8] sm:$0xff]  ;;  %v182_v50 = vld [vmem:[%s1942_s5 + $0x40] sm:$0xff]  ;;  %v232_v51 = vld [vmem:[%s1942_s5 + $0x1d0] sm:$0xff]  ;;  %v381_v53 = vmul.f32 %v281_v43, %v181_v47 }
  0x16   : > { %v431_v54 = vmul.f32 %v331_v44, %v231_v48  ;;  %v382_v57 = vmul.f32 %v282_v49, %v182_v50  ;;  %v432_v58 = vmul.f32 %v332_v52, %v232_v51  ;;  %v183_v59 = vld [vmem:[%s1942_s5 + $0x48] sm:$0xff]  ;;  %v233_v60 = vld [vmem:[%s1942_s5 + $0x1d8] sm:$0xff]  ;;  %v184_v62 = vld [vmem:[%s1942_s5 + $0x50] sm:$0xff] }
  0x17   : > { %v234_v63 = vld [vmem:[%s1942_s5 + $0x1e0] sm:$0xff]  ;;  %v383_v1 = vmul.f32 %v283_v55, %v183_v59  ;;  %v433_v2 = vmul.f32 %v333_v56, %v233_v60  ;;  %v185_v3 = vld [vmem:[%s1942_s5 + $0x58] sm:$0xff]  ;;  %v384_v5 = vmul.f32 %v284_v61, %v184_v62  ;;  %v235_v7 = vld [vmem:[%s1942_s5 + $0x1e8] sm:$0xff] }
  0x18   : > { %1717 = vmatmul.mubr.msk.f32.gmra.mrb[2].mxu0 %vm476_vm0, %v377_v29  ;;  %1792 = vmatmul.mubr.msk.f32.gmra.mrb[2].mxu1 %vm476_vm0, %v427_v30  ;;  %v285_v4 = vld [vmem:[%s2640_s1 + $0x58] sm:$0xff]  ;;  %v434_v6 = vmul.f32 %v334_v0, %v234_v63  ;;  %v335_v8 = vld [vmem:[%s2640_s1 + $0x1e8] sm:$0xff]  ;;  %v186_v9 = vld [vmem:[%s1942_s5 + $0x60] sm:$0xff] }
  0x19   : > { %1719 = vmatprep.mubr.msk.f32.mxu0 %vm476_vm0, %v378_v33  ;;  %1794 = vmatprep.mubr.msk.f32.mxu1 %vm476_vm0, %v428_v34  ;;  %v286_v10 = vld [vmem:[%s2640_s1 + $0x60] sm:$0xff]  ;;  %v236_v11 = vld [vmem:[%s1942_s5 + $0x1f0] sm:$0xff]  ;;  %v385_v13 = vmul.f32 %v285_v4, %v185_v3  ;;  %v435_v14 = vmul.f32 %v335_v8, %v235_v7  ;;  %v187_v15 = vld [vmem:[%s1942_s5 + $0x68] sm:$0xff] }
  0x1a   : > { %v336_v12 = vld [vmem:[%s2640_s1 + $0x1f0] sm:$0xff]  ;;  %v287_v16 = vld [vmem:[%s2640_s1 + $0x68] sm:$0xff]  ;;  %v386_v17 = vmul.f32 %v286_v10, %v186_v9  ;;  %v237_v19 = vld [vmem:[%s1942_s5 + $0x1f8] sm:$0xff] }
  0x1b   : > { %v436_v18 = vmul.f32 %v336_v12, %v236_v11  ;;  %v337_v20 = vld [vmem:[%s2640_s1 + $0x1f8] sm:$0xff]  ;;  %v188_v21 = vld [vmem:[%s1942_s5 + $0x70] sm:$0xff]  ;;  %v238_v23 = vld [vmem:[%s1942_s5 + $0x200] sm:$0xff]  ;;  %v387_v25 = vmul.f32 %v287_v16, %v187_v15 }
  0x1c   : > { %1720 = vmatmul.mubr.msk.f32.gmra.mrb[4].mxu0 %vm476_vm0, %v379_v41  ;;  %1795 = vmatmul.mubr.msk.f32.gmra.mrb[4].mxu1 %vm476_vm0, %v429_v42  ;;  %v288_v22 = vld [vmem:[%s2640_s1 + $0x70] sm:$0xff]  ;;  %v338_v24 = vld [vmem:[%s2640_s1 + $0x200] sm:$0xff]  ;;  %v437_v26 = vmul.f32 %v337_v20, %v237_v19  ;;  %v189_v27 = vld [vmem:[%s1942_s5 + $0x78] sm:$0xff] }
  0x1d   : > { %1722 = vmatprep.mubr.msk.f32.mxu0 %vm476_vm0, %v380_v45  ;;  %1797 = vmatprep.mubr.msk.f32.mxu1 %vm476_vm0, %v430_v46  ;;  %v289_v28 = vld [vmem:[%s2640_s1 + $0x78] sm:$0xff]  ;;  %v388_v29 = vmul.f32 %v288_v22, %v188_v21  ;;  %v438_v30 = vmul.f32 %v338_v24, %v238_v23  ;;  %v239_v31 = vld [vmem:[%s1942_s5 + $0x208] sm:$0xff]  ;;  %v190_v33 = vld [vmem:[%s1942_s5 + $0x80] sm:$0xff] }
  0x1e   : > { %v339_v32 = vld [vmem:[%s2640_s1 + $0x208] sm:$0xff]  ;;  %v290_v34 = vld [vmem:[%s2640_s1 + $0x80] sm:$0xff]  ;;  %v240_v35 = vld [vmem:[%s1942_s5 + $0x210] sm:$0xff]  ;;  %v389_v37 = vmul.f32 %v289_v28, %v189_v27 }
  0x1f   : > { %v340_v36 = vld [vmem:[%s2640_s1 + $0x210] sm:$0xff]  ;;  %v439_v38 = vmul.f32 %v339_v32, %v239_v31  ;;  %v191_v39 = vld [vmem:[%s1942_s5 + $0x88] sm:$0xff]  ;;  %v390_v41 = vmul.f32 %v290_v34, %v190_v33  ;;  %v241_v43 = vld [vmem:[%s1942_s5 + $0x218] sm:$0xff] }
  0x20   : > { %1723 = vmatmul.mubr.msk.f32.gmra.mrb[6].mxu0 %vm476_vm0, %v381_v53  ;;  %1798 = vmatmul.mubr.msk.f32.gmra.mrb[6].mxu1 %vm476_vm0, %v431_v54  ;;  %v291_v40 = vld [vmem:[%s2640_s1 + $0x88] sm:$0xff]  ;;  %v440_v42 = vmul.f32 %v340_v36, %v240_v35  ;;  %v341_v44 = vld [vmem:[%s2640_s1 + $0x218] sm:$0xff]  ;;  %v192_v45 = vld [vmem:[%s1942_s5 + $0x90] sm:$0xff] }
  0x21   : > { %1725 = vmatprep.mubr.msk.f32.mxu0 %vm476_vm0, %v382_v57  ;;  %1800 = vmatprep.mubr.msk.f32.mxu1 %vm476_vm0, %v432_v58  ;;  %v292_v46 = vld [vmem:[%s2640_s1 + $0x90] sm:$0xff]  ;;  %v242_v47 = vld [vmem:[%s1942_s5 + $0x220] sm:$0xff]  ;;  %v391_v49 = vmul.f32 %v291_v40, %v191_v39  ;;  %v441_v50 = vmul.f32 %v341_v44, %v241_v43  ;;  %v193_v51 = vld [vmem:[%s1942_s5 + $0x98] sm:$0xff] }
  0x22   : > { %v342_v48 = vld [vmem:[%s2640_s1 + $0x220] sm:$0xff]  ;;  %v293_v52 = vld [vmem:[%s2640_s1 + $0x98] sm:$0xff]  ;;  %v392_v53 = vmul.f32 %v292_v46, %v192_v45  ;;  %v243_v55 = vld [vmem:[%s1942_s5 + $0x228] sm:$0xff] }
  0x23   : > { %v442_v54 = vmul.f32 %v342_v48, %v242_v47  ;;  %v343_v56 = vld [vmem:[%s2640_s1 + $0x228] sm:$0xff]  ;;  %v194_v57 = vld [vmem:[%s1942_s5 + $0xa0] sm:$0xff]  ;;  %v244_v59 = vld [vmem:[%s1942_s5 + $0x230] sm:$0xff]  ;;  %v393_v61 = vmul.f32 %v293_v52, %v193_v51 }
  0x24   : > { %1726 = vmatmul.mubr.msk.f32.gmra.mrb[8].mxu0 %vm476_vm0, %v383_v1  ;;  %1801 = vmatmul.mubr.msk.f32.gmra.mrb[8].mxu1 %vm476_vm0, %v433_v2  ;;  %v294_v58 = vld [vmem:[%s2640_s1 + $0xa0] sm:$0xff]  ;;  %v344_v60 = vld [vmem:[%s2640_s1 + $0x230] sm:$0xff]  ;;  %v443_v62 = vmul.f32 %v343_v56, %v243_v55  ;;  %v195_v63 = vld [vmem:[%s1942_s5 + $0xa8] sm:$0xff] }
  0x25   : > { %1728 = vmatprep.mubr.msk.f32.mxu0 %vm476_vm0, %v384_v5  ;;  %1803 = vmatprep.mubr.msk.f32.mxu1 %vm476_vm0, %v434_v6  ;;  %v295_v0 = vld [vmem:[%s2640_s1 + $0xa8] sm:$0xff]  ;;  %v394_v1 = vmul.f32 %v294_v58, %v194_v57  ;;  %v444_v2 = vmul.f32 %v344_v60, %v244_v59  ;;  %v245_v3 = vld [vmem:[%s1942_s5 + $0x238] sm:$0xff]  ;;  %v196_v5 = vld [vmem:[%s1942_s5 + $0xb0] sm:$0xff] }
  0x26   : > { %v345_v4 = vld [vmem:[%s2640_s1 + $0x238] sm:$0xff]  ;;  %v296_v6 = vld [vmem:[%s2640_s1 + $0xb0] sm:$0xff]  ;;  %v246_v7 = vld [vmem:[%s1942_s5 + $0x240] sm:$0xff]  ;;  %v395_v9 = vmul.f32 %v295_v0, %v195_v63 }
  0x27   : > { %v346_v8 = vld [vmem:[%s2640_s1 + $0x240] sm:$0xff]  ;;  %v445_v10 = vmul.f32 %v345_v4, %v245_v3  ;;  %v197_v11 = vld [vmem:[%s1942_s5 + $0xb8] sm:$0xff]  ;;  %v247_v15 = vld [vmem:[%s1942_s5 + $0x248] sm:$0xff] }
  0x28   : > { %1729 = vmatmul.mubr.msk.f32.gmra.mrb[10].mxu0 %vm476_vm0, %v385_v13  ;;  %1804 = vmatmul.mubr.msk.f32.gmra.mrb[10].mxu1 %vm476_vm0, %v435_v14  ;;  %v297_v12 = vld [vmem:[%s2640_s1 + $0xb8] sm:$0xff]  ;;  %v396_v13 = vmul.f32 %v296_v6, %v196_v5  ;;  %v446_v14 = vmul.f32 %v346_v8, %v246_v7  ;;  %v347_v16 = vld [vmem:[%s2640_s1 + $0x248] sm:$0xff]  ;;  %v248_v19 = vld [vmem:[%s1942_s5 + $0x250] sm:$0xff] }
  0x29   : > { %1731 = vmatprep.mubr.msk.f32.mxu0 %vm476_vm0, %v386_v17  ;;  %1806 = vmatprep.mubr.msk.f32.mxu1 %vm476_vm0, %v436_v18  ;;  %v198_v17 = vld [vmem:[%s1942_s5 + $0xc0] sm:$0xff]  ;;  %v348_v20 = vld [vmem:[%s2640_s1 + $0x250] sm:$0xff]  ;;  %v397_v21 = vmul.f32 %v297_v12, %v197_v11  ;;  %v447_v22 = vmul.f32 %v347_v16, %v247_v15  ;;  %v199_v23 = vld [vmem:[%s1942_s5 + $0xc8] sm:$0xff] }
  0x2a   : > { %v298_v18 = vld [vmem:[%s2640_s1 + $0xc0] sm:$0xff]  ;;  %v299_v24 = vld [vmem:[%s2640_s1 + $0xc8] sm:$0xff]  ;;  %v249_v27 = vld [vmem:[%s1942_s5 + $0x258] sm:$0xff] }
  0x2b   : > { %v349_v28 = vld [vmem:[%s2640_s1 + $0x258] sm:$0xff]  ;;  %v250_v31 = vld [vmem:[%s1942_s5 + $0x260] sm:$0xff]  ;;  %v399_v33 = vmul.f32 %v299_v24, %v199_v23  ;;  %v251_v39 = vld [vmem:[%s1942_s5 + $0x268] sm:$0xff] }
  0x2c   : > { %1732 = vmatmul.mubr.msk.f32.gmra.mrb[12].mxu0 %vm476_vm0, %v387_v25  ;;  %1807 = vmatmul.mubr.msk.f32.gmra.mrb[12].mxu1 %vm476_vm0, %v437_v26  ;;  %v398_v25 = vmul.f32 %v298_v18, %v198_v17  ;;  %v448_v26 = vmul.f32 %v348_v20, %v248_v19  ;;  %v350_v32 = vld [vmem:[%s2640_s1 + $0x260] sm:$0xff]  ;;  %v449_v34 = vmul.f32 %v349_v28, %v249_v27  ;;  %v201_v35 = vld [vmem:[%s1942_s5 + $0xd8] sm:$0xff]  ;;  %v351_v40 = vld [vmem:[%s2640_s1 + $0x268] sm:$0xff] }
  0x2d   : > { %1734 = vmatprep.mubr.msk.f32.mxu0 %vm476_vm0, %v388_v29  ;;  %1809 = vmatprep.mubr.msk.f32.mxu1 %vm476_vm0, %v438_v30  ;;  %v200_v29 = vld [vmem:[%s1942_s5 + $0xd0] sm:$0xff]  ;;  %v301_v36 = vld [vmem:[%s2640_s1 + $0xd8] sm:$0xff]  ;;  %v451_v46 = vmul.f32 %v351_v40, %v251_v39  ;;  %v203_v47 = vld [vmem:[%s1942_s5 + $0xe8] sm:$0xff] }
  0x2e   : > { %v300_v30 = vld [vmem:[%s2640_s1 + $0xd0] sm:$0xff]  ;;  %v401_v45 = vmul.f32 %v301_v36, %v201_v35  ;;  %v303_v48 = vld [vmem:[%s2640_s1 + $0xe8] sm:$0xff]  ;;  %v253_v51 = vld [vmem:[%s1942_s5 + $0x278] sm:$0xff] }
  0x2f   : > { %v252_v43 = vld [vmem:[%s1942_s5 + $0x270] sm:$0xff]  ;;  %v353_v52 = vld [vmem:[%s2640_s1 + $0x278] sm:$0xff]  ;;  %v254_v55 = vld [vmem:[%s1942_s5 + $0x280] sm:$0xff]  ;;  %v403_v57 = vmul.f32 %v303_v48, %v203_v47 }
  0x30   : > { %1735 = vmatmul.mubr.msk.f32.gmra.mrb[14].mxu0 %vm476_vm0, %v389_v37  ;;  %1810 = vmatmul.mubr.msk.f32.gmra.mrb[14].mxu1 %vm476_vm0, %v439_v38  ;;  %v400_v37 = vmul.f32 %v300_v30, %v200_v29  ;;  %v450_v38 = vmul.f32 %v350_v32, %v250_v31  ;;  %v352_v44 = vld [vmem:[%s2640_s1 + $0x270] sm:$0xff]  ;;  %v354_v56 = vld [vmem:[%s2640_s1 + $0x280] sm:$0xff]  ;;  %v453_v58 = vmul.f32 %v353_v52, %v253_v51  ;;  %v205_v59 = vld [vmem:[%s1942_s5 + $0xf8] sm:$0xff] }
  0x31   : > { %1737 = vmatprep.mubr.msk.f32.mxu0 %vm476_vm0, %v390_v41  ;;  %1812 = vmatprep.mubr.msk.f32.mxu1 %vm476_vm0, %v440_v42  ;;  %v202_v41 = vld [vmem:[%s1942_s5 + $0xe0] sm:$0xff]  ;;  %v305_v60 = vld [vmem:[%s2640_s1 + $0xf8] sm:$0xff]  ;;  %v255_v63 = vld [vmem:[%s1942_s5 + $0x288] sm:$0xff] }
  0x32   : > { %v302_v42 = vld [vmem:[%s2640_s1 + $0xe0] sm:$0xff]  ;;  %v355_v0 = vld [vmem:[%s2640_s1 + $0x288] sm:$0xff]  ;;  %v256_v3 = vld [vmem:[%s1942_s5 + $0x290] sm:$0xff]  ;;  %v405_v5 = vmul.f32 %v305_v60, %v205_v59 }
  0x33   : > { %v356_v4 = vld [vmem:[%s2640_s1 + $0x290] sm:$0xff]  ;;  %v455_v6 = vmul.f32 %v355_v0, %v255_v63  ;;  %v207_v7 = vld [vmem:[%s1942_s5 + $0x108] sm:$0xff]  ;;  %v257_v11 = vld [vmem:[%s1942_s5 + $0x298] sm:$0xff] }
  0x34   : > { %1738 = vmatmul.mubr.msk.f32.gmra.mrb[16].mxu0 %vm476_vm0, %v391_v49  ;;  %1813 = vmatmul.mubr.msk.f32.gmra.mrb[16].mxu1 %vm476_vm0, %v441_v50  ;;  %v402_v49 = vmul.f32 %v302_v42, %v202_v41  ;;  %v452_v50 = vmul.f32 %v352_v44, %v252_v43  ;;  %v307_v8 = vld [vmem:[%s2640_s1 + $0x108] sm:$0xff]  ;;  %v357_v12 = vld [vmem:[%s2640_s1 + $0x298] sm:$0xff]  ;;  %v258_v15 = vld [vmem:[%s1942_s5 + $0x2a0] sm:$0xff] }
  0x35   : > { %1740 = vmatprep.mubr.msk.f32.mxu0 %vm476_vm0, %v392_v53  ;;  %1815 = vmatprep.mubr.msk.f32.mxu1 %vm476_vm0, %v442_v54  ;;  %v204_v53 = vld [vmem:[%s1942_s5 + $0xf0] sm:$0xff]  ;;  %v358_v16 = vld [vmem:[%s2640_s1 + $0x2a0] sm:$0xff]  ;;  %v407_v17 = vmul.f32 %v307_v8, %v207_v7  ;;  %v457_v18 = vmul.f32 %v357_v12, %v257_v11  ;;  %v209_v19 = vld [vmem:[%s1942_s5 + $0x118] sm:$0xff] }
  0x36   : > { %v304_v54 = vld [vmem:[%s2640_s1 + $0xf0] sm:$0xff]  ;;  %v309_v20 = vld [vmem:[%s2640_s1 + $0x118] sm:$0xff]  ;;  %v259_v23 = vld [vmem:[%s1942_s5 + $0x2a8] sm:$0xff] }
  0x37   : > { %v359_v24 = vld [vmem:[%s2640_s1 + $0x2a8] sm:$0xff]  ;;  %v260_v27 = vld [vmem:[%s1942_s5 + $0x2b0] sm:$0xff]  ;;  %v409_v29 = vmul.f32 %v309_v20, %v209_v19  ;;  %v261_v35 = vld [vmem:[%s1942_s5 + $0x2b8] sm:$0xff] }
  0x38   : > { %1741 = vmatmul.mubr.msk.f32.gmra.mrb[18].mxu0 %vm476_vm0, %v393_v61  ;;  %1816 = vmatmul.mubr.msk.f32.gmra.mrb[18].mxu1 %vm476_vm0, %v443_v62  ;;  %v404_v61 = vmul.f32 %v304_v54, %v204_v53  ;;  %v454_v62 = vmul.f32 %v354_v56, %v254_v55  ;;  %v360_v28 = vld [vmem:[%s2640_s1 + $0x2b0] sm:$0xff]  ;;  %v459_v30 = vmul.f32 %v359_v24, %v259_v23  ;;  %v211_v31 = vld [vmem:[%s1942_s5 + $0x128] sm:$0xff]  ;;  %v361_v36 = vld [vmem:[%s2640_s1 + $0x2b8] sm:$0xff] }
  0x39   : > { %1743 = vmatprep.mubr.msk.f32.mxu0 %vm476_vm0, %v394_v1  ;;  %1818 = vmatprep.mubr.msk.f32.mxu1 %vm476_vm0, %v444_v2  ;;  %v206_v1 = vld [vmem:[%s1942_s5 + $0x100] sm:$0xff]  ;;  %v311_v32 = vld [vmem:[%s2640_s1 + $0x128] sm:$0xff]  ;;  %v461_v42 = vmul.f32 %v361_v36, %v261_v35  ;;  %v213_v43 = vld [vmem:[%s1942_s5 + $0x138] sm:$0xff] }
  0x3a   : > { %v306_v2 = vld [vmem:[%s2640_s1 + $0x100] sm:$0xff]  ;;  %v411_v41 = vmul.f32 %v311_v32, %v211_v31  ;;  %v313_v44 = vld [vmem:[%s2640_s1 + $0x138] sm:$0xff]  ;;  %v263_v47 = vld [vmem:[%s1942_s5 + $0x2c8] sm:$0xff] }
  0x3b   : > { %v262_v39 = vld [vmem:[%s1942_s5 + $0x2c0] sm:$0xff]  ;;  %v363_v48 = vld [vmem:[%s2640_s1 + $0x2c8] sm:$0xff]  ;;  %v264_v51 = vld [vmem:[%s1942_s5 + $0x2d0] sm:$0xff]  ;;  %v413_v53 = vmul.f32 %v313_v44, %v213_v43 }
  0x3c   : > { %1744 = vmatmul.mubr.msk.f32.gmra.mrb[20].mxu0 %vm476_vm0, %v395_v9  ;;  %1819 = vmatmul.mubr.msk.f32.gmra.mrb[20].mxu1 %vm476_vm0, %v445_v10  ;;  %v406_v9 = vmul.f32 %v306_v2, %v206_v1  ;;  %v456_v10 = vmul.f32 %v356_v4, %v256_v3  ;;  %v362_v40 = vld [vmem:[%s2640_s1 + $0x2c0] sm:$0xff]  ;;  %v364_v52 = vld [vmem:[%s2640_s1 + $0x2d0] sm:$0xff]  ;;  %v463_v54 = vmul.f32 %v363_v48, %v263_v47  ;;  %v215_v55 = vld [vmem:[%s1942_s5 + $0x148] sm:$0xff] }
  0x3d   : > { %1746 = vmatprep.mubr.msk.f32.mxu0 %vm476_vm0, %v396_v13  ;;  %1821 = vmatprep.mubr.msk.f32.mxu1 %vm476_vm0, %v446_v14  ;;  %v208_v13 = vld [vmem:[%s1942_s5 + $0x110] sm:$0xff]  ;;  %v315_v56 = vld [vmem:[%s2640_s1 + $0x148] sm:$0xff]  ;;  %v265_v59 = vld [vmem:[%s1942_s5 + $0x2d8] sm:$0xff] }
  0x3e   : > { %v308_v14 = vld [vmem:[%s2640_s1 + $0x110] sm:$0xff]  ;;  %v365_v60 = vld [vmem:[%s2640_s1 + $0x2d8] sm:$0xff]  ;;  %v266_v63 = vld [vmem:[%s1942_s5 + $0x2e0] sm:$0xff]  ;;  %v415_v1 = vmul.f32 %v315_v56, %v215_v55 }
  0x3f   : > { %v366_v0 = vld [vmem:[%s2640_s1 + $0x2e0] sm:$0xff]  ;;  %v465_v2 = vmul.f32 %v365_v60, %v265_v59  ;;  %v217_v3 = vld [vmem:[%s1942_s5 + $0x158] sm:$0xff]  ;;  %v267_v7 = vld [vmem:[%s1942_s5 + $0x2e8] sm:$0xff] }
  0x40   : > { %1747 = vmatmul.mubr.msk.f32.gmra.mrb[22].mxu0 %vm476_vm0, %v397_v21  ;;  %1822 = vmatmul.mubr.msk.f32.gmra.mrb[22].mxu1 %vm476_vm0, %v447_v22  ;;  %v408_v21 = vmul.f32 %v308_v14, %v208_v13  ;;  %v458_v22 = vmul.f32 %v358_v16, %v258_v15  ;;  %v317_v4 = vld [vmem:[%s2640_s1 + $0x158] sm:$0xff]  ;;  %v367_v8 = vld [vmem:[%s2640_s1 + $0x2e8] sm:$0xff]  ;;  %v268_v11 = vld [vmem:[%s1942_s5 + $0x2f0] sm:$0xff] }
  0x41   : > { %1749 = vmatprep.mubr.msk.f32.mxu0 %vm476_vm0, %v398_v25  ;;  %1824 = vmatprep.mubr.msk.f32.mxu1 %vm476_vm0, %v448_v26  ;;  %v210_v25 = vld [vmem:[%s1942_s5 + $0x120] sm:$0xff]  ;;  %v368_v12 = vld [vmem:[%s2640_s1 + $0x2f0] sm:$0xff]  ;;  %v417_v13 = vmul.f32 %v317_v4, %v217_v3  ;;  %v467_v14 = vmul.f32 %v367_v8, %v267_v7  ;;  %v219_v15 = vld [vmem:[%s1942_s5 + $0x168] sm:$0xff] }
  0x42   : > { %v310_v26 = vld [vmem:[%s2640_s1 + $0x120] sm:$0xff]  ;;  %v319_v16 = vld [vmem:[%s2640_s1 + $0x168] sm:$0xff]  ;;  %v269_v19 = vld [vmem:[%s1942_s5 + $0x2f8] sm:$0xff] }
  0x43   : > { %v369_v20 = vld [vmem:[%s2640_s1 + $0x2f8] sm:$0xff]  ;;  %v270_v23 = vld [vmem:[%s1942_s5 + $0x300] sm:$0xff]  ;;  %v271_v31 = vld [vmem:[%s1942_s5 + $0x308] sm:$0xff] }
  0x44   : > { %1750 = vmatmul.mubr.msk.f32.gmra.mrb[24].mxu0 %vm476_vm0, %v399_v33  ;;  %1825 = vmatmul.mubr.msk.f32.gmra.mrb[24].mxu1 %vm476_vm0, %v449_v34  ;;  %v410_v33 = vmul.f32 %v310_v26, %v210_v25  ;;  %v460_v34 = vmul.f32 %v360_v28, %v260_v27  ;;  %v370_v24 = vld [vmem:[%s2640_s1 + $0x300] sm:$0xff]  ;;  %v419_v25 = vmul.f32 %v319_v16, %v219_v15  ;;  %v221_v27 = vld [vmem:[%s1942_s5 + $0x178] sm:$0xff]  ;;  %v371_v32 = vld [vmem:[%s2640_s1 + $0x308] sm:$0xff] }
  0x45   : > { %1752 = vmatprep.mubr.msk.f32.mxu0 %vm476_vm0, %v400_v37  ;;  %1827 = vmatprep.mubr.msk.f32.mxu1 %vm476_vm0, %v450_v38  ;;  %v212_v37 = vld [vmem:[%s1942_s5 + $0x130] sm:$0xff]  ;;  %v469_v26 = vmul.f32 %v369_v20, %v269_v19  ;;  %v321_v28 = vld [vmem:[%s2640_s1 + $0x178] sm:$0xff] }
  0x46   : > { %v312_v38 = vld [vmem:[%s2640_s1 + $0x130] sm:$0xff]  ;;  %v273_v43 = vld [vmem:[%s1942_s5 + $0x318] sm:$0xff] }
  0x47   : > { %v272_v35 = vld [vmem:[%s1942_s5 + $0x310] sm:$0xff]  ;;  %v373_v44 = vld [vmem:[%s2640_s1 + $0x318] sm:$0xff] }
  0x48   : > { %1753 = vmatmul.mubr.msk.f32.gmra.mrb[26].mxu0 %vm476_vm0, %v401_v45  ;;  %1828 = vmatmul.mubr.msk.f32.gmra.mrb[26].mxu1 %vm476_vm0, %v451_v46  ;;  %v412_v45 = vmul.f32 %v312_v38, %v212_v37  ;;  %v462_v46 = vmul.f32 %v362_v40, %v262_v39  ;;  %v372_v36 = vld [vmem:[%s2640_s1 + $0x310] sm:$0xff]  ;;  %v421_v37 = vmul.f32 %v321_v28, %v221_v27  ;;  %v223_v39 = vld [vmem:[%s1942_s5 + $0x188] sm:$0xff] }
  0x49   : > { %1755 = vmatprep.mubr.msk.f32.mxu0 %vm476_vm0, %v402_v49  ;;  %1830 = vmatprep.mubr.msk.f32.mxu1 %vm476_vm0, %v452_v50  ;;  %v214_v49 = vld [vmem:[%s1942_s5 + $0x140] sm:$0xff]  ;;  %v471_v38 = vmul.f32 %v371_v32, %v271_v31 }
  0x4a   : > { %v314_v50 = vld [vmem:[%s2640_s1 + $0x140] sm:$0xff] }
  0x4c   : > { %1756 = vmatmul.mubr.msk.f32.gmra.mrb[28].mxu0 %vm476_vm0, %v403_v57  ;;  %1831 = vmatmul.mubr.msk.f32.gmra.mrb[28].mxu1 %vm476_vm0, %v453_v58  ;;  %v414_v57 = vmul.f32 %v314_v50, %v214_v49  ;;  %v464_v58 = vmul.f32 %v364_v52, %v264_v51 }
  0x4d   : > { %1758 = vmatprep.mubr.msk.f32.mxu0 %vm476_vm0, %v404_v61  ;;  %1833 = vmatprep.mubr.msk.f32.mxu1 %vm476_vm0, %v454_v62  ;;  %v216_v61 = vld [vmem:[%s1942_s5 + $0x150] sm:$0xff] }
  0x4e   : > { %v316_v62 = vld [vmem:[%s2640_s1 + $0x150] sm:$0xff] }
  0x50   : > { %1759 = vmatmul.mubr.msk.f32.gmra.mrb[30].mxu0 %vm476_vm0, %v405_v5  ;;  %1834 = vmatmul.mubr.msk.f32.gmra.mrb[30].mxu1 %vm476_vm0, %v455_v6  ;;  %v416_v5 = vmul.f32 %v316_v62, %v216_v61  ;;  %v466_v6 = vmul.f32 %v366_v0, %v266_v63 }
  0x51   : > { %1761 = vmatprep.mubr.msk.f32.mxu0 %vm476_vm0, %v406_v9  ;;  %1836 = vmatprep.mubr.msk.f32.mxu1 %vm476_vm0, %v456_v10  ;;  %v218_v9 = vld [vmem:[%s1942_s5 + $0x160] sm:$0xff] }
  0x52   : > { %v318_v10 = vld [vmem:[%s2640_s1 + $0x160] sm:$0xff] }
  0x54   : > { %1762 = vmatmul.mubr.msk.f32.gmra.mrb[32].mxu0 %vm476_vm0, %v407_v17  ;;  %1837 = vmatmul.mubr.msk.f32.gmra.mrb[32].mxu1 %vm476_vm0, %v457_v18  ;;  %v418_v17 = vmul.f32 %v318_v10, %v218_v9  ;;  %v468_v18 = vmul.f32 %v368_v12, %v268_v11 }
  0x55   : > { %1764 = vmatprep.mubr.msk.f32.mxu0 %vm476_vm0, %v408_v21  ;;  %1839 = vmatprep.mubr.msk.f32.mxu1 %vm476_vm0, %v458_v22  ;;  %v220_v21 = vld [vmem:[%s1942_s5 + $0x170] sm:$0xff] }
  0x56   : > { %v320_v22 = vld [vmem:[%s2640_s1 + $0x170] sm:$0xff] }
  0x58   : > { %1765 = vmatmul.mubr.msk.f32.gmra.mrb[34].mxu0 %vm476_vm0, %v409_v29  ;;  %1840 = vmatmul.mubr.msk.f32.gmra.mrb[34].mxu1 %vm476_vm0, %v459_v30  ;;  %v420_v29 = vmul.f32 %v320_v22, %v220_v21  ;;  %v470_v30 = vmul.f32 %v370_v24, %v270_v23 }
  0x59   : > { %1767 = vmatprep.mubr.msk.f32.mxu0 %vm476_vm0, %v410_v33  ;;  %1842 = vmatprep.mubr.msk.f32.mxu1 %vm476_vm0, %v460_v34  ;;  %v222_v33 = vld [vmem:[%s1942_s5 + $0x180] sm:$0xff] }
  0x5a   : > { %v322_v34 = vld [vmem:[%s2640_s1 + $0x180] sm:$0xff] }
  0x5b   : > { %v422_v40 = vmul.f32 %v322_v34, %v222_v33 }
  0x5c   : > { %1768 = vmatmul.mubr.msk.f32.gmra.mrb[36].mxu0 %vm476_vm0, %v411_v41  ;;  %1843 = vmatmul.mubr.msk.f32.gmra.mrb[36].mxu1 %vm476_vm0, %v461_v42  ;;  %v472_v41 = vmul.f32 %v372_v36, %v272_v35  ;;  %v323_v42 = vld [vmem:[%s2640_s1 + $0x188] sm:$0xff] }
  0x5d   : > { %1770 = vmatprep.mubr.msk.f32.mxu0 %vm476_vm0, %v412_v45  ;;  %1845 = vmatprep.mubr.msk.f32.mxu1 %vm476_vm0, %v462_v46  ;;  %v423_v45 = vmul.f32 %v323_v42, %v223_v39  ;;  %v473_v46 = vmul.f32 %v373_v44, %v273_v43 }
  0x60   : > { %1771 = vmatmul.mubr.msk.f32.gmra.mrb[38].mxu0 %vm476_vm0, %v413_v53  ;;  %1846 = vmatmul.mubr.msk.f32.gmra.mrb[38].mxu1 %vm476_vm0, %v463_v54 }
  0x61   : > { %1773 = vmatprep.mubr.msk.f32.mxu0 %vm476_vm0, %v414_v57  ;;  %1848 = vmatprep.mubr.msk.f32.mxu1 %vm476_vm0, %v464_v58 }
  0x64   : > { %1774 = vmatmul.mubr.msk.f32.gmra.mrb[40].mxu0 %vm476_vm0, %v415_v1  ;;  %1849 = vmatmul.mubr.msk.f32.gmra.mrb[40].mxu1 %vm476_vm0, %v465_v2 }
  0x65   : > { %1776 = vmatprep.mubr.msk.f32.mxu0 %vm476_vm0, %v416_v5  ;;  %1851 = vmatprep.mubr.msk.f32.mxu1 %vm476_vm0, %v466_v6 }
  0x68   : > { %1777 = vmatmul.mubr.msk.f32.gmra.mrb[42].mxu0 %vm476_vm0, %v417_v13  ;;  %1852 = vmatmul.mubr.msk.f32.gmra.mrb[42].mxu1 %vm476_vm0, %v467_v14 }
  0x69   : > { %1779 = vmatprep.mubr.msk.f32.mxu0 %vm476_vm0, %v418_v17  ;;  %1854 = vmatprep.mubr.msk.f32.mxu1 %vm476_vm0, %v468_v18 }
  0x6c   : > { %1780 = vmatmul.mubr.msk.f32.gmra.mrb[44].mxu0 %vm476_vm0, %v419_v25  ;;  %1855 = vmatmul.mubr.msk.f32.gmra.mrb[44].mxu1 %vm476_vm0, %v469_v26 }
  0x6d   : > { %1782 = vmatprep.mubr.msk.f32.mxu0 %vm476_vm0, %v420_v29  ;;  %1857 = vmatprep.mubr.msk.f32.mxu1 %vm476_vm0, %v470_v30 }
  0x70   : > { %1783 = vmatmul.mubr.msk.f32.gmra.mrb[46].mxu0 %vm476_vm0, %v421_v37  ;;  %1858 = vmatmul.mubr.msk.f32.gmra.mrb[46].mxu1 %vm476_vm0, %v471_v38 }
  0x71   : > { %1785 = vmatprep.mubr.msk.f32.mxu0 %vm476_vm0, %v422_v40  ;;  %1860 = vmatprep.mubr.msk.f32.mxu1 %vm476_vm0, %v472_v41 }
  0x74   : > { %1786 = vmatmul.mubr.msk.f32.gmra.mrb[48].mxu0 %vm476_vm0, %v423_v45  ;;  %1861 = vmatmul.mubr.msk.f32.gmra.mrb[48].mxu1 %vm476_vm0, %v473_v46 }
  0xe7   : > { %v1715_v47 = vpop.f32.mrb[0].mxu0  ;;  %v1790_v48 = vpop.f32.mrb[0].mxu1 }
  0xe8   : > { %1343 = vst.msk [vmem:[%s2434_s14 + $0x8] sm:$0xff] %vm476_vm0, %v1715_v47  ;;  %1393 = vst.msk [vmem:[%s2434_s14 + $0x198] sm:$0xff] %vm476_vm0, %v1790_v48  ;;  %v843_v49 = vpop.f32.mrb[1].mxu0  ;;  %v1093_v50 = vpop.f32.mrb[1].mxu1 }
  0xe9   : > { %1342 = vst.msk [vmem:[%s2434_s14] sm:$0xff] %vm476_vm0, %v843_v49  ;;  %1392 = vst.msk [vmem:[%s2434_s14 + $0x190] sm:$0xff] %vm476_vm0, %v1093_v50 }
  0xeb   : > { %v1718_v51 = vpop.f32.mrb[2].mxu0  ;;  %v1793_v52 = vpop.f32.mrb[2].mxu1 }
  0xec   : > { %1345 = vst.msk [vmem:[%s2434_s14 + $0x18] sm:$0xff] %vm476_vm0, %v1718_v51  ;;  %1395 = vst.msk [vmem:[%s2434_s14 + $0x1a8] sm:$0xff] %vm476_vm0, %v1793_v52  ;;  %v853_v53 = vpop.f32.mrb[3].mxu0  ;;  %v1103_v54 = vpop.f32.mrb[3].mxu1 }
  0xed   : > { %1344 = vst.msk [vmem:[%s2434_s14 + $0x10] sm:$0xff] %vm476_vm0, %v853_v53  ;;  %1394 = vst.msk [vmem:[%s2434_s14 + $0x1a0] sm:$0xff] %vm476_vm0, %v1103_v54 }
  0xef   : > { %v1721_v55 = vpop.f32.mrb[4].mxu0  ;;  %v1796_v56 = vpop.f32.mrb[4].mxu1 }
  0xf0   : > { %1347 = vst.msk [vmem:[%s2434_s14 + $0x28] sm:$0xff] %vm476_vm0, %v1721_v55  ;;  %1397 = vst.msk [vmem:[%s2434_s14 + $0x1b8] sm:$0xff] %vm476_vm0, %v1796_v56  ;;  %v863_v57 = vpop.f32.mrb[5].mxu0  ;;  %v1113_v58 = vpop.f32.mrb[5].mxu1 }
  0xf1   : > { %1346 = vst.msk [vmem:[%s2434_s14 + $0x20] sm:$0xff] %vm476_vm0, %v863_v57  ;;  %1396 = vst.msk [vmem:[%s2434_s14 + $0x1b0] sm:$0xff] %vm476_vm0, %v1113_v58 }
  0xf3   : > { %v1724_v59 = vpop.f32.mrb[6].mxu0  ;;  %v1799_v60 = vpop.f32.mrb[6].mxu1 }
  0xf4   : > { %1349 = vst.msk [vmem:[%s2434_s14 + $0x38] sm:$0xff] %vm476_vm0, %v1724_v59  ;;  %1399 = vst.msk [vmem:[%s2434_s14 + $0x1c8] sm:$0xff] %vm476_vm0, %v1799_v60  ;;  %v873_v61 = vpop.f32.mrb[7].mxu0  ;;  %v1123_v62 = vpop.f32.mrb[7].mxu1 }
  0xf5   : > { %1348 = vst.msk [vmem:[%s2434_s14 + $0x30] sm:$0xff] %vm476_vm0, %v873_v61  ;;  %1398 = vst.msk [vmem:[%s2434_s14 + $0x1c0] sm:$0xff] %vm476_vm0, %v1123_v62 }
  0xf7   : > { %v1727_v63 = vpop.f32.mrb[8].mxu0  ;;  %v1802_v0 = vpop.f32.mrb[8].mxu1 }
  0xf8   : > { %1351 = vst.msk [vmem:[%s2434_s14 + $0x48] sm:$0xff] %vm476_vm0, %v1727_v63  ;;  %1401 = vst.msk [vmem:[%s2434_s14 + $0x1d8] sm:$0xff] %vm476_vm0, %v1802_v0  ;;  %v883_v1 = vpop.f32.mrb[9].mxu0  ;;  %v1133_v2 = vpop.f32.mrb[9].mxu1 }
  0xf9   : > { %1350 = vst.msk [vmem:[%s2434_s14 + $0x40] sm:$0xff] %vm476_vm0, %v883_v1  ;;  %1400 = vst.msk [vmem:[%s2434_s14 + $0x1d0] sm:$0xff] %vm476_vm0, %v1133_v2 }
  0xfb   : > { %v1730_v3 = vpop.f32.mrb[10].mxu0  ;;  %v1805_v4 = vpop.f32.mrb[10].mxu1 }
  0xfc   : > { %1353 = vst.msk [vmem:[%s2434_s14 + $0x58] sm:$0xff] %vm476_vm0, %v1730_v3  ;;  %1403 = vst.msk [vmem:[%s2434_s14 + $0x1e8] sm:$0xff] %vm476_vm0, %v1805_v4  ;;  %v893_v5 = vpop.f32.mrb[11].mxu0  ;;  %v1143_v6 = vpop.f32.mrb[11].mxu1 }
  0xfd   : > { %1352 = vst.msk [vmem:[%s2434_s14 + $0x50] sm:$0xff] %vm476_vm0, %v893_v5  ;;  %1402 = vst.msk [vmem:[%s2434_s14 + $0x1e0] sm:$0xff] %vm476_vm0, %v1143_v6 }
  0xff   : > { %v1733_v7 = vpop.f32.mrb[12].mxu0  ;;  %v1808_v8 = vpop.f32.mrb[12].mxu1 }
 0x100   : > { %1355 = vst.msk [vmem:[%s2434_s14 + $0x68] sm:$0xff] %vm476_vm0, %v1733_v7  ;;  %1405 = vst.msk [vmem:[%s2434_s14 + $0x1f8] sm:$0xff] %vm476_vm0, %v1808_v8  ;;  %v903_v9 = vpop.f32.mrb[13].mxu0  ;;  %v1153_v10 = vpop.f32.mrb[13].mxu1 }
 0x101   : > { %1354 = vst.msk [vmem:[%s2434_s14 + $0x60] sm:$0xff] %vm476_vm0, %v903_v9  ;;  %1404 = vst.msk [vmem:[%s2434_s14 + $0x1f0] sm:$0xff] %vm476_vm0, %v1153_v10 }
 0x103   : > { %v1736_v11 = vpop.f32.mrb[14].mxu0  ;;  %v1811_v12 = vpop.f32.mrb[14].mxu1 }
 0x104   : > { %1357 = vst.msk [vmem:[%s2434_s14 + $0x78] sm:$0xff] %vm476_vm0, %v1736_v11  ;;  %1407 = vst.msk [vmem:[%s2434_s14 + $0x208] sm:$0xff] %vm476_vm0, %v1811_v12  ;;  %v913_v13 = vpop.f32.mrb[15].mxu0  ;;  %v1163_v14 = vpop.f32.mrb[15].mxu1 }
 0x105   : > { %1356 = vst.msk [vmem:[%s2434_s14 + $0x70] sm:$0xff] %vm476_vm0, %v913_v13  ;;  %1406 = vst.msk [vmem:[%s2434_s14 + $0x200] sm:$0xff] %vm476_vm0, %v1163_v14 }
 0x107   : > { %v1739_v15 = vpop.f32.mrb[16].mxu0  ;;  %v1814_v16 = vpop.f32.mrb[16].mxu1 }
 0x108   : > { %1359 = vst.msk [vmem:[%s2434_s14 + $0x88] sm:$0xff] %vm476_vm0, %v1739_v15  ;;  %1409 = vst.msk [vmem:[%s2434_s14 + $0x218] sm:$0xff] %vm476_vm0, %v1814_v16  ;;  %v923_v17 = vpop.f32.mrb[17].mxu0  ;;  %v1173_v18 = vpop.f32.mrb[17].mxu1 }
 0x109   : > { %1358 = vst.msk [vmem:[%s2434_s14 + $0x80] sm:$0xff] %vm476_vm0, %v923_v17  ;;  %1408 = vst.msk [vmem:[%s2434_s14 + $0x210] sm:$0xff] %vm476_vm0, %v1173_v18 }
 0x10b   : > { %v1742_v19 = vpop.f32.mrb[18].mxu0  ;;  %v1817_v20 = vpop.f32.mrb[18].mxu1 }
 0x10c   : > { %1361 = vst.msk [vmem:[%s2434_s14 + $0x98] sm:$0xff] %vm476_vm0, %v1742_v19  ;;  %1411 = vst.msk [vmem:[%s2434_s14 + $0x228] sm:$0xff] %vm476_vm0, %v1817_v20  ;;  %v933_v21 = vpop.f32.mrb[19].mxu0  ;;  %v1183_v22 = vpop.f32.mrb[19].mxu1 }
 0x10d   : > { %1360 = vst.msk [vmem:[%s2434_s14 + $0x90] sm:$0xff] %vm476_vm0, %v933_v21  ;;  %1410 = vst.msk [vmem:[%s2434_s14 + $0x220] sm:$0xff] %vm476_vm0, %v1183_v22 }
 0x10f   : > { %v1745_v23 = vpop.f32.mrb[20].mxu0  ;;  %v1820_v24 = vpop.f32.mrb[20].mxu1 }
 0x110   : > { %1363 = vst.msk [vmem:[%s2434_s14 + $0xa8] sm:$0xff] %vm476_vm0, %v1745_v23  ;;  %1413 = vst.msk [vmem:[%s2434_s14 + $0x238] sm:$0xff] %vm476_vm0, %v1820_v24  ;;  %v943_v25 = vpop.f32.mrb[21].mxu0  ;;  %v1193_v26 = vpop.f32.mrb[21].mxu1 }
 0x111   : > { %1362 = vst.msk [vmem:[%s2434_s14 + $0xa0] sm:$0xff] %vm476_vm0, %v943_v25  ;;  %1412 = vst.msk [vmem:[%s2434_s14 + $0x230] sm:$0xff] %vm476_vm0, %v1193_v26 }
 0x113   : > { %v1748_v27 = vpop.f32.mrb[22].mxu0  ;;  %v1823_v28 = vpop.f32.mrb[22].mxu1 }
 0x114   : > { %1365 = vst.msk [vmem:[%s2434_s14 + $0xb8] sm:$0xff] %vm476_vm0, %v1748_v27  ;;  %1415 = vst.msk [vmem:[%s2434_s14 + $0x248] sm:$0xff] %vm476_vm0, %v1823_v28  ;;  %v953_v29 = vpop.f32.mrb[23].mxu0  ;;  %v1203_v30 = vpop.f32.mrb[23].mxu1 }
 0x115   : > { %1364 = vst.msk [vmem:[%s2434_s14 + $0xb0] sm:$0xff] %vm476_vm0, %v953_v29  ;;  %1414 = vst.msk [vmem:[%s2434_s14 + $0x240] sm:$0xff] %vm476_vm0, %v1203_v30 }
 0x117   : > { %v1751_v31 = vpop.f32.mrb[24].mxu0  ;;  %v1826_v32 = vpop.f32.mrb[24].mxu1 }
 0x118   : > { %1367 = vst.msk [vmem:[%s2434_s14 + $0xc8] sm:$0xff] %vm476_vm0, %v1751_v31  ;;  %1417 = vst.msk [vmem:[%s2434_s14 + $0x258] sm:$0xff] %vm476_vm0, %v1826_v32  ;;  %v963_v33 = vpop.f32.mrb[25].mxu0  ;;  %v1213_v34 = vpop.f32.mrb[25].mxu1 }
 0x119   : > { %1366 = vst.msk [vmem:[%s2434_s14 + $0xc0] sm:$0xff] %vm476_vm0, %v963_v33  ;;  %1416 = vst.msk [vmem:[%s2434_s14 + $0x250] sm:$0xff] %vm476_vm0, %v1213_v34 }
 0x11b   : > { %v1754_v35 = vpop.f32.mrb[26].mxu0  ;;  %v1829_v36 = vpop.f32.mrb[26].mxu1 }
 0x11c   : > { %1369 = vst.msk [vmem:[%s2434_s14 + $0xd8] sm:$0xff] %vm476_vm0, %v1754_v35  ;;  %1419 = vst.msk [vmem:[%s2434_s14 + $0x268] sm:$0xff] %vm476_vm0, %v1829_v36  ;;  %v973_v37 = vpop.f32.mrb[27].mxu0  ;;  %v1223_v38 = vpop.f32.mrb[27].mxu1 }
 0x11d   : > { %1368 = vst.msk [vmem:[%s2434_s14 + $0xd0] sm:$0xff] %vm476_vm0, %v973_v37  ;;  %1418 = vst.msk [vmem:[%s2434_s14 + $0x260] sm:$0xff] %vm476_vm0, %v1223_v38 }
 0x11f   : > { %v1757_v39 = vpop.f32.mrb[28].mxu0  ;;  %v1832_v40 = vpop.f32.mrb[28].mxu1 }
 0x120   : > { %1371 = vst.msk [vmem:[%s2434_s14 + $0xe8] sm:$0xff] %vm476_vm0, %v1757_v39  ;;  %1421 = vst.msk [vmem:[%s2434_s14 + $0x278] sm:$0xff] %vm476_vm0, %v1832_v40  ;;  %v983_v41 = vpop.f32.mrb[29].mxu0  ;;  %v1233_v42 = vpop.f32.mrb[29].mxu1 }
 0x121   : > { %1370 = vst.msk [vmem:[%s2434_s14 + $0xe0] sm:$0xff] %vm476_vm0, %v983_v41  ;;  %1420 = vst.msk [vmem:[%s2434_s14 + $0x270] sm:$0xff] %vm476_vm0, %v1233_v42 }
 0x123   : > { %v1760_v43 = vpop.f32.mrb[30].mxu0  ;;  %v1835_v44 = vpop.f32.mrb[30].mxu1 }
 0x124   : > { %1373 = vst.msk [vmem:[%s2434_s14 + $0xf8] sm:$0xff] %vm476_vm0, %v1760_v43  ;;  %1423 = vst.msk [vmem:[%s2434_s14 + $0x288] sm:$0xff] %vm476_vm0, %v1835_v44  ;;  %v993_v45 = vpop.f32.mrb[31].mxu0  ;;  %v1243_v46 = vpop.f32.mrb[31].mxu1 }
 0x125   : > { %1372 = vst.msk [vmem:[%s2434_s14 + $0xf0] sm:$0xff] %vm476_vm0, %v993_v45  ;;  %1422 = vst.msk [vmem:[%s2434_s14 + $0x280] sm:$0xff] %vm476_vm0, %v1243_v46 }
 0x127   : > { %v1763_v47 = vpop.f32.mrb[32].mxu0  ;;  %v1838_v48 = vpop.f32.mrb[32].mxu1 }
 0x128   : > { %1375 = vst.msk [vmem:[%s2434_s14 + $0x108] sm:$0xff] %vm476_vm0, %v1763_v47  ;;  %1425 = vst.msk [vmem:[%s2434_s14 + $0x298] sm:$0xff] %vm476_vm0, %v1838_v48  ;;  %v1003_v49 = vpop.f32.mrb[33].mxu0  ;;  %v1253_v50 = vpop.f32.mrb[33].mxu1 }
 0x129   : > { %1374 = vst.msk [vmem:[%s2434_s14 + $0x100] sm:$0xff] %vm476_vm0, %v1003_v49  ;;  %1424 = vst.msk [vmem:[%s2434_s14 + $0x290] sm:$0xff] %vm476_vm0, %v1253_v50 }
 0x12b   : > { %v1766_v51 = vpop.f32.mrb[34].mxu0  ;;  %v1841_v52 = vpop.f32.mrb[34].mxu1 }
 0x12c   : > { %1377 = vst.msk [vmem:[%s2434_s14 + $0x118] sm:$0xff] %vm476_vm0, %v1766_v51  ;;  %1427 = vst.msk [vmem:[%s2434_s14 + $0x2a8] sm:$0xff] %vm476_vm0, %v1841_v52  ;;  %v1013_v53 = vpop.f32.mrb[35].mxu0  ;;  %v1263_v54 = vpop.f32.mrb[35].mxu1 }
 0x12d   : > { %1376 = vst.msk [vmem:[%s2434_s14 + $0x110] sm:$0xff] %vm476_vm0, %v1013_v53  ;;  %1426 = vst.msk [vmem:[%s2434_s14 + $0x2a0] sm:$0xff] %vm476_vm0, %v1263_v54 }
 0x12f   : > { %v1769_v55 = vpop.f32.mrb[36].mxu0  ;;  %v1844_v56 = vpop.f32.mrb[36].mxu1 }
 0x130   : > { %1379 = vst.msk [vmem:[%s2434_s14 + $0x128] sm:$0xff] %vm476_vm0, %v1769_v55  ;;  %1429 = vst.msk [vmem:[%s2434_s14 + $0x2b8] sm:$0xff] %vm476_vm0, %v1844_v56  ;;  %v1023_v57 = vpop.f32.mrb[37].mxu0  ;;  %v1273_v58 = vpop.f32.mrb[37].mxu1 }
 0x131   : > { %1378 = vst.msk [vmem:[%s2434_s14 + $0x120] sm:$0xff] %vm476_vm0, %v1023_v57  ;;  %1428 = vst.msk [vmem:[%s2434_s14 + $0x2b0] sm:$0xff] %vm476_vm0, %v1273_v58 }
 0x133   : > { %v1772_v59 = vpop.f32.mrb[38].mxu0  ;;  %v1847_v60 = vpop.f32.mrb[38].mxu1 }
 0x134   : > { %1381 = vst.msk [vmem:[%s2434_s14 + $0x138] sm:$0xff] %vm476_vm0, %v1772_v59  ;;  %1431 = vst.msk [vmem:[%s2434_s14 + $0x2c8] sm:$0xff] %vm476_vm0, %v1847_v60  ;;  %v1033_v61 = vpop.f32.mrb[39].mxu0  ;;  %v1283_v62 = vpop.f32.mrb[39].mxu1 }
 0x135   : > { %1380 = vst.msk [vmem:[%s2434_s14 + $0x130] sm:$0xff] %vm476_vm0, %v1033_v61  ;;  %1430 = vst.msk [vmem:[%s2434_s14 + $0x2c0] sm:$0xff] %vm476_vm0, %v1283_v62 }
 0x137   : > { %v1775_v63 = vpop.f32.mrb[40].mxu0  ;;  %v1850_v0 = vpop.f32.mrb[40].mxu1 }
 0x138   : > { %1383 = vst.msk [vmem:[%s2434_s14 + $0x148] sm:$0xff] %vm476_vm0, %v1775_v63  ;;  %1433 = vst.msk [vmem:[%s2434_s14 + $0x2d8] sm:$0xff] %vm476_vm0, %v1850_v0  ;;  %v1043_v1 = vpop.f32.mrb[41].mxu0  ;;  %v1293_v2 = vpop.f32.mrb[41].mxu1 }
 0x139   : > { %1382 = vst.msk [vmem:[%s2434_s14 + $0x140] sm:$0xff] %vm476_vm0, %v1043_v1  ;;  %1432 = vst.msk [vmem:[%s2434_s14 + $0x2d0] sm:$0xff] %vm476_vm0, %v1293_v2 }
 0x13b   : > { %v1778_v3 = vpop.f32.mrb[42].mxu0  ;;  %v1853_v4 = vpop.f32.mrb[42].mxu1 }
 0x13c   : > { %1385 = vst.msk [vmem:[%s2434_s14 + $0x158] sm:$0xff] %vm476_vm0, %v1778_v3  ;;  %1435 = vst.msk [vmem:[%s2434_s14 + $0x2e8] sm:$0xff] %vm476_vm0, %v1853_v4  ;;  %v1053_v5 = vpop.f32.mrb[43].mxu0  ;;  %v1303_v6 = vpop.f32.mrb[43].mxu1 }
 0x13d   : > { %1384 = vst.msk [vmem:[%s2434_s14 + $0x150] sm:$0xff] %vm476_vm0, %v1053_v5  ;;  %1434 = vst.msk [vmem:[%s2434_s14 + $0x2e0] sm:$0xff] %vm476_vm0, %v1303_v6 }
 0x13f   : > { %v1781_v7 = vpop.f32.mrb[44].mxu0  ;;  %v1856_v8 = vpop.f32.mrb[44].mxu1 }
 0x140   : > { %1387 = vst.msk [vmem:[%s2434_s14 + $0x168] sm:$0xff] %vm476_vm0, %v1781_v7  ;;  %1437 = vst.msk [vmem:[%s2434_s14 + $0x2f8] sm:$0xff] %vm476_vm0, %v1856_v8  ;;  %v1063_v9 = vpop.f32.mrb[45].mxu0  ;;  %v1313_v10 = vpop.f32.mrb[45].mxu1 }
 0x141   : > { %1386 = vst.msk [vmem:[%s2434_s14 + $0x160] sm:$0xff] %vm476_vm0, %v1063_v9  ;;  %1436 = vst.msk [vmem:[%s2434_s14 + $0x2f0] sm:$0xff] %vm476_vm0, %v1313_v10 }
 0x143   : > { %v1784_v11 = vpop.f32.mrb[46].mxu0  ;;  %v1859_v12 = vpop.f32.mrb[46].mxu1 }
 0x144   : > { %1389 = vst.msk [vmem:[%s2434_s14 + $0x178] sm:$0xff] %vm476_vm0, %v1784_v11  ;;  %1439 = vst.msk [vmem:[%s2434_s14 + $0x308] sm:$0xff] %vm476_vm0, %v1859_v12  ;;  %v1073_v13 = vpop.f32.mrb[47].mxu0  ;;  %v1323_v14 = vpop.f32.mrb[47].mxu1 }
 0x145   : > { %1388 = vst.msk [vmem:[%s2434_s14 + $0x170] sm:$0xff] %vm476_vm0, %v1073_v13  ;;  %1438 = vst.msk [vmem:[%s2434_s14 + $0x300] sm:$0xff] %vm476_vm0, %v1323_v14 }
 0x147   : > { %v1787_v15 = vpop.f32.mrb[48].mxu0  ;;  %v1862_v16 = vpop.f32.mrb[48].mxu1 }
 0x148   : > { %1391 = vst.msk [vmem:[%s2434_s14 + $0x188] sm:$0xff] %vm476_vm0, %v1787_v15  ;;  %1441 = vst.msk [vmem:[%s2434_s14 + $0x318] sm:$0xff] %vm476_vm0, %v1862_v16  ;;  %v1083_v17 = vpop.f32.mrb[49].mxu0  ;;  %v1333_v18 = vpop.f32.mrb[49].mxu1 }
 0x149   : > { %1390 = vst.msk [vmem:[%s2434_s14 + $0x180] sm:$0xff] %vm476_vm0, %v1083_v17  ;;  %1440 = vst.msk [vmem:[%s2434_s14 + $0x310] sm:$0xff] %vm476_vm0, %v1333_v18 }
 0x14a PF: > { %s13_s12 = sadd.s32 1, %s1883_s12  }
 0x14b   : > { %p10_p4 = scmp.ge.s32.totalorder %s13_s12, 6  }
 0x14d   :  { %12 = sbr.rel (!%p10_p4) target bundleno = 1 (0x1), region = 62 }

</bundles_post_ra>
